<compile_context>
chip_gen: v5e
topology: v5e:2x2
jax: 0.10.0
libtpu: 0.0.40
codegen_flags: <defaults>
</compile_context>

<pallas_src>
import jax
import jax.numpy as jnp
from jax import lax
from jax.experimental import pallas as pl
from jax.experimental.pallas import tpu as pltpu


def _round_up(n: int, m: int) -> int:
    return ((n + m - 1) // m) * m


def _cdiv(a: int, b: int) -> int:
    return (a + b - 1) // b


def _vmem_capacity_bytes() -> int:
    """Physical VMEM per core; conservative default if the query is unavailable."""
    try:
        info = pltpu.get_tpu_info()
        cap = getattr(info, "vmem_capacity_bytes", None)
        if cap:
            return int(cap)
    except Exception:
        pass
    return 64 * 1024 * 1024  # v7x per-TC VMEM (smallest current generation)


# -----------------------------------------------------------------------------
# Kernels
# -----------------------------------------------------------------------------
def _vild_kernel(x_ref, w_ref, b_ref, o_ref):
    """Fast path: full-width (padded) weight resident in VMEM."""
    y = jnp.dot(x_ref[...], w_ref[...], preferred_element_type=jnp.float32)
    y = y + b_ref[...]  # (1, out_pad) f32 broadcasts over batch rows
    # L2 normalize (dim=1).  Padded feature columns are exactly zero so they do
    # not perturb the row norm.  rsqrt goes to the EUP slot.
    sq = jnp.sum(y * y, axis=-1, keepdims=True)
    inv = lax.rsqrt(jnp.maximum(sq, 1e-24))  # == 1 / max(||y||, 1e-12)
    o_ref[...] = (y * inv).astype(o_ref.dtype)


def _vild_kernel_ntiled(x_ref, w_ref, b_ref, o_ref, ss_ref):
    """Fallback: output (class) axis tiled; sum-of-squares carried in scratch.

    Grid = (batch_tiles, n_tiles); the N axis is last ("arbitrary") so the
    output row block stays resident across it and is written once, normalized,
    on the final N step.
    """
    j = pl.program_id(1)
    tn = w_ref.shape[1]

    y = jnp.dot(x_ref[...], w_ref[...], preferred_element_type=jnp.float32)
    y = y + b_ref[...]

    @pl.when(j == 0)
    def _():
        ss_ref[...] = jnp.zeros_like(ss_ref)

    ss_ref[...] += jnp.sum(y * y, axis=-1, keepdims=True)

    col = pl.multiple_of(j * tn, 128)
    o_ref[:, pl.ds(col, tn)] = y.astype(o_ref.dtype)

    @pl.when(j == pl.num_programs(1) - 1)
    def _():
        inv = lax.rsqrt(jnp.maximum(ss_ref[...], 1e-24))
        o_ref[...] = (o_ref[...].astype(jnp.float32) * inv).astype(o_ref.dtype)


# -----------------------------------------------------------------------------
# Parameter preparation (do this once at model init, not per forward call)
# -----------------------------------------------------------------------------
def prepare_vild_params(weight, bias, *, param_dtype=None):
    """Pad feature axes to multiples of 128 and pre-transpose W to [in, out]."""
    out_dim, in_dim = weight.shape
    in_pad = _round_up(in_dim, 128)
    out_pad = _round_up(out_dim, 128)
    w_dt = jnp.dtype(param_dtype) if param_dtype is not None else weight.dtype

    wt = weight.T.astype(w_dt)
    if (in_pad, out_pad) != (in_dim, out_dim):
        w_t = jnp.zeros((in_pad, out_pad), w_dt).at[:in_dim, :out_dim].set(wt)
    else:
        w_t = wt
    # Bias kept in f32 (added after the f32 MXU accumulation).
    b2d = jnp.zeros((1, out_pad), jnp.float32).at[0, :out_dim].set(
        bias.astype(jnp.float32)
    )
    return w_t, b2d, out_dim


# -----------------------------------------------------------------------------
# Tile selection (generation-aware VMEM budget)
# -----------------------------------------------------------------------------
def _select_tiles(B, in_pad, out_pad, x_item, w_item, o_item, block_b, budget):
    """Returns (tb, tn).  tn is None for the fast (resident weight) path."""
    min_tiles = 2 if B >= 16 else 1  # >=2 grid steps: v7x megacore + pipelining
    n_btiles = max(min_tiles, _cdiv(B, block_b))
    tb0 = max(8, _round_up(_cdiv(B, n_btiles), 8))

    w_bytes = in_pad * out_pad * w_item  # single-buffered (pl.Buffered(1))

    def fits_fast(tb):
        return (
            w_bytes
            + out_pad * 4                      # bias
            + 2 * tb * in_pad * x_item         # x, double-buffered
            + 2 * tb * out_pad * o_item        # out, double-buffered
            + tb * out_pad * 4                 # in-kernel f32 y temp
        ) <= budget

    tb = tb0
    while tb > 8 and not fits_fast(tb):
        tb = max(8, _round_up(tb // 2, 8))
    if fits_fast(tb):
        return tb, None

    # Fallback: also tile the output (class) dimension.
    def fits_n(tb_, tn_):
        return (
            2 * in_pad * tn_ * w_item          # W tiles, double-buffered
            + 2 * tn_ * 4                      # bias tiles
            + 2 * tb_ * in_pad * x_item        # x, double-buffered
            + 2 * tb_ * out_pad * o_item       # out row block, double-buffered
            + tb_ * tn_ * 4                    # f32 y temp
            + tb_ * 4                          # sum-of-squares scratch
        ) <= budget

    m = out_pad // 128
    tb = tb0
    while True:
        for d in range(m, 0, -1):              # largest divisor => fewest N steps
            if m % d == 0 and fits_n(tb, 128 * d):
                return tb, 128 * d
        if tb <= 8:
            return 8, 128                      # best effort; rely on vmem_limit headroom
        tb = max(8, _round_up(tb // 2, 8))


# -----------------------------------------------------------------------------
# Forward
# -----------------------------------------------------------------------------
def vild_head_apply(x, w_t, b2d, out_dim, *, block_b=1024, compute_dtype=None,
                    vmem_budget_bytes=None):
    """x: [B, input_dim]; w_t: [in_pad, out_pad]; b2d: [1, out_pad] (prepared)."""
    B, in_dim = x.shape
    in_pad, out_pad = w_t.shape

    x_dt = jnp.dtype(compute_dtype) if compute_dtype is not None else x.dtype
    o_dtype = x.dtype
    x_item = jnp.dtype(x_dt).itemsize
    w_item = jnp.dtype(w_t.dtype).itemsize
    o_item = jnp.dtype(o_dtype).itemsize

    cap = _vmem_capacity_bytes()
    budget = vmem_budget_bytes if vmem_budget_bytes is not None else int(cap * 0.70)
    vmem_limit = int(cap * 0.90)

    tb, tn = _select_tiles(B, in_pad, out_pad, x_item, w_item, o_item,
                           block_b, budget)
    b_tiles = _cdiv(B, tb)
    b_pad = b_tiles * tb

    # Skip the x pad copy whenever shapes are already tile-aligned.
    if b_pad == B and in_pad == in_dim and x.dtype == x_dt:
        x_p = x
    else:
        x_p = jnp.zeros((b_pad, in_pad), x_dt).at[:B, :in_dim].set(x.astype(x_dt))

    if tn is None:
        # ------------------------- fast path --------------------------------
        def call(resident_mode):
            kwargs = {} if resident_mode is None else {"pipeline_mode": resident_mode}
            return pl.pallas_call(
                _vild_kernel,
                out_shape=jax.ShapeDtypeStruct((b_pad, out_pad), o_dtype),
                grid_spec=pltpu.PrefetchScalarGridSpec(
                    num_scalar_prefetch=0,
                    grid=(b_tiles,),
                    in_specs=[
                        # x: one batch tile per grid step (pipelined).
                        pl.BlockSpec((tb, in_pad), lambda i: (i, 0)),
                        # W / bias: constant block index -> VMEM-resident.
                        pl.BlockSpec((in_pad, out_pad), lambda i: (0, 0), **kwargs),
                        pl.BlockSpec((1, out_pad), lambda i: (0, 0), **kwargs),
                    ],
                    out_specs=pl.BlockSpec((tb, out_pad), lambda i: (i, 0)),
                ),
                compiler_params=pltpu.CompilerParams(
                    dimension_semantics=("parallel",),
                    vmem_limit_bytes=vmem_limit,
                ),
            )(x_p, w_t, b2d)

        try:
            out_padded = call(pl.Buffered(1))   # single-buffer the resident weight
        except Exception:
            out_padded = call(None)             # fallback: default double buffering
    else:
        # --------------------- N-tiled fallback path ------------------------
        n_tiles = out_pad // tn
        out_padded = pl.pallas_call(
            _vild_kernel_ntiled,
            out_shape=jax.ShapeDtypeStruct((b_pad, out_pad), o_dtype),
            grid_spec=pltpu.PrefetchScalarGridSpec(
                num_scalar_prefetch=0,
                grid=(b_tiles, n_tiles),
                in_specs=[
                    pl.BlockSpec((tb, in_pad), lambda i, j: (i, 0)),
                    pl.BlockSpec((in_pad, tn), lambda i, j: (0, j)),
                    pl.BlockSpec((1, tn), lambda i, j: (0, j)),
                ],
                out_specs=pl.BlockSpec((tb, out_pad), lambda i, j: (i, 0)),
                scratch_shapes=[pltpu.VMEM((tb, 1), jnp.float32)],
            ),
            compiler_params=pltpu.CompilerParams(
                dimension_semantics=("parallel", "arbitrary"),
                vmem_limit_bytes=vmem_limit,
            ),
        )(x_p, w_t, b2d)

    if b_pad == B and out_pad == out_dim:
        return out_padded
    return out_padded[:B, :out_dim]


def vild_head(x, weight, bias, **kwargs):
    """Convenience one-shot API (prepares params per call; prefer prepare+apply)."""
    w_t, b2d, out_dim = prepare_vild_params(weight, bias)
    return vild_head_apply(x, w_t, b2d, out_dim, **kwargs)


# -----------------------------------------------------------------------------
# Self-test
# -----------------------------------------------------------------------------
if __name__ == "__main__":
    key = jax.random.PRNGKey(0)

    # --- Test 1: small shapes, fast path (resident full-width weight) -------
    B, input_dim, output_dim = 8, 32, 16
    kx, kw, kb, k2 = jax.random.split(key, 4)

    x = jax.random.normal(kx, (B, input_dim), dtype=jnp.float32)
    bound = 1.0 / (input_dim ** 0.5)   # mimic nn.Linear init scale
    weight = jax.random.uniform(
        kw, (output_dim, input_dim), dtype=jnp.float32, minval=-bound, maxval=bound
    )
    bias = jax.random.uniform(
        kb, (output_dim,), dtype=jnp.float32, minval=-bound, maxval=bound
    )

    w_t, b2d, odim = prepare_vild_params(weight, bias)   # once, at "init"
    out = vild_head_apply(x, w_t, b2d, odim)
    jax.block_until_ready(out)

    y_ref = x @ weight.T + bias
    ref = y_ref / jnp.maximum(jnp.linalg.norm(y_ref, axis=1, keepdims=True), 1e-12)
    assert out.shape == (B, output_dim)
    assert jnp.allclose(out, ref, atol=1e-5, rtol=1e-5)

    # --- Test 2: force the N-tiled fallback (weight "too big" for budget) ---
    B2, in2, out2 = 64, 256, 512
    ka, kb2, kc = jax.random.split(k2, 3)
    x2 = jax.random.normal(ka, (B2, in2), dtype=jnp.float32)
    bound2 = 1.0 / (in2 ** 0.5)
    w2 = jax.random.uniform(kb2, (out2, in2), dtype=jnp.float32,
                            minval=-bound2, maxval=bound2)
    b2 = jax.random.uniform(kc, (out2,), dtype=jnp.float32,
                            minval=-bound2, maxval=bound2)

    w2_t, b2_2d, odim2 = prepare_vild_params(w2, b2)
    out_b = vild_head_apply(x2, w2_t, b2_2d, odim2, vmem_budget_bytes=400 * 1024)
    jax.block_until_ready(out_b)

    y2 = x2 @ w2.T + b2
    ref2 = y2 / jnp.maximum(jnp.linalg.norm(y2, axis=1, keepdims=True), 1e-12)
    assert out_b.shape == (B2, out2)
    assert jnp.allclose(out_b, ref2, atol=1e-4, rtol=1e-4)

    print("KERNEL_OK")
</pallas_src>

<mosaic_0001>
module attributes {stable_mosaic.version = 11 : i64} {
  func.func @_vild_kernel(%arg0: i32, %arg1: memref<8x128xf32, #tpu.memory_space<vmem>>, %arg2: memref<128x128xf32, #tpu.memory_space<vmem>>, %arg3: memref<1x128xf32, #tpu.memory_space<vmem>>, %arg4: memref<8x128xf32, #tpu.memory_space<vmem>>) attributes {dimension_semantics = [#tpu.dimension_semantics<parallel>], iteration_bounds = array<i64: 1>, scalar_prefetch = 0 : i64, scratch_operands = 0 : i64, tpu.core_type = #tpu.core_type<tc>, window_params = [{transform_indices = @transform_0, window_bounds = array<i64: 8, 128>}, {pipeline_mode = #tpu.pipeline_mode<synchronous>, transform_indices = @transform_1, window_bounds = array<i64: 128, 128>}, {pipeline_mode = #tpu.pipeline_mode<synchronous>, transform_indices = @transform_2, window_bounds = array<i64: 1, 128>}, {transform_indices = @transform_3, window_bounds = array<i64: 8, 128>}]} {
    %c0 = arith.constant 0 : index
    %c0_0 = arith.constant 0 : index
    %0 = vector.load %arg1[%c0, %c0_0] : memref<8x128xf32, #tpu.memory_space<vmem>>, vector<8x128xf32>
    %c0_1 = arith.constant 0 : index
    %c0_2 = arith.constant 0 : index
    %1 = vector.load %arg2[%c0_1, %c0_2] : memref<128x128xf32, #tpu.memory_space<vmem>>, vector<128x128xf32>
    %cst = arith.constant dense<0.000000e+00> : vector<8x128xf32>
    %2 = tpu.matmul %0, %1, %cst {dimension_numbers = #tpu.dot_dimension_numbers<[1], [0], [0], [1], [0, 0, 1, 1], [], []>} : vector<8x128xf32>, vector<128x128xf32>, vector<8x128xf32> -> vector<8x128xf32>
    %c0_3 = arith.constant 0 : index
    %c0_4 = arith.constant 0 : index
    %3 = vector.load %arg3[%c0_3, %c0_4] : memref<1x128xf32, #tpu.memory_space<vmem>>, vector<1x128xf32>
    %4 = vector.broadcast %3 : vector<1x128xf32> to vector<8x128xf32>
    %5 = arith.addf %2, %4 : vector<8x128xf32>
    %6 = arith.mulf %5, %5 : vector<8x128xf32>
    %cst_5 = arith.constant dense<0.000000e+00> : vector<8xf32>
    %7 = vector.multi_reduction <add>, %6, %cst_5 [1] : vector<8x128xf32> to vector<8xf32>
    %8 = vector.shape_cast %7 : vector<8xf32> to vector<8x1xf32>
    %cst_6 = arith.constant 1.000000e-24 : f32
    %9 = vector.broadcast %cst_6 : f32 to vector<8x1xf32>
    %10 = arith.maximumf %8, %9 : vector<8x1xf32>
    %11 = math.rsqrt %10 : vector<8x1xf32>
    %12 = vector.broadcast %11 : vector<8x1xf32> to vector<8x128xf32>
    %13 = arith.mulf %5, %12 : vector<8x128xf32>
    %c0_7 = arith.constant 0 : index
    %c0_8 = arith.constant 0 : index
    %14 = vector.load %arg4[%c0_7, %c0_8] : memref<8x128xf32, #tpu.memory_space<vmem>>, vector<8x128xf32>
    tpu.vector_store %arg4[%c0_7, %c0_8], %13 {strides = array<i32>} : memref<8x128xf32, #tpu.memory_space<vmem>>, vector<8x128xf32>,
    return
  }
  func.func @transform_0(%arg0: i32) -> (i32, i32) {
    %c0_i32 = arith.constant 0 : i32
    %c0_i32_0 = arith.constant 0 : i32
    return %arg0, %c0_i32 : i32, i32
  }
  func.func @transform_1(%arg0: i32) -> (i32, i32) {
    %c0_i32 = arith.constant 0 : i32
    %c0_i32_0 = arith.constant 0 : i32
    %c0_i32_1 = arith.constant 0 : i32
    return %c0_i32, %c0_i32_0 : i32, i32
  }
  func.func @transform_2(%arg0: i32) -> (i32, i32) {
    %c0_i32 = arith.constant 0 : i32
    %c0_i32_0 = arith.constant 0 : i32
    %c0_i32_1 = arith.constant 0 : i32
    return %c0_i32, %c0_i32_0 : i32, i32
  }
  func.func @transform_3(%arg0: i32) -> (i32, i32) {
    %c0_i32 = arith.constant 0 : i32
    %c0_i32_0 = arith.constant 0 : i32
    return %arg0, %c0_i32 : i32, i32
  }
}

module attributes {stable_mosaic.version = 11 : i64} {
  func.func @_vild_kernel(%arg0: i32, %arg1: memref<8x128xf32, #tpu.memory_space<vmem>>, %arg2: memref<128x128xf32, #tpu.memory_space<vmem>>, %arg3: memref<1x128xf32, #tpu.memory_space<vmem>>, %arg4: memref<8x128xf32, #tpu.memory_space<vmem>>) attributes {dimension_semantics = [#tpu.dimension_semantics<parallel>], iteration_bounds = array<i64: 1>, scalar_prefetch = 0 : i64, scratch_operands = 0 : i64, tpu.core_type = #tpu.core_type<tc>, window_params = [{transform_indices = @transform_0, window_bounds = array<i64: 8, 128>}, {pipeline_mode = #tpu.pipeline_mode<synchronous>, transform_indices = @transform_1, window_bounds = array<i64: 128, 128>}, {pipeline_mode = #tpu.pipeline_mode<synchronous>, transform_indices = @transform_2, window_bounds = array<i64: 1, 128>}, {transform_indices = @transform_3, window_bounds = array<i64: 8, 128>}]} {
    %c0 = arith.constant 0 : index
    %c0_0 = arith.constant 0 : index
    %0 = vector.load %arg1[%c0, %c0_0] : memref<8x128xf32, #tpu.memory_space<vmem>>, vector<8x128xf32>
    %c0_1 = arith.constant 0 : index
    %c0_2 = arith.constant 0 : index
    %1 = vector.load %arg2[%c0_1, %c0_2] : memref<128x128xf32, #tpu.memory_space<vmem>>, vector<128x128xf32>
    %cst = arith.constant dense<0.000000e+00> : vector<8x128xf32>
    %2 = tpu.matmul %0, %1, %cst {dimension_numbers = #tpu.dot_dimension_numbers<[1], [0], [0], [1], [0, 0, 1, 1], [], []>} : vector<8x128xf32>, vector<128x128xf32>, vector<8x128xf32> -> vector<8x128xf32>
    %c0_3 = arith.constant 0 : index
    %c0_4 = arith.constant 0 : index
    %3 = vector.load %arg3[%c0_3, %c0_4] : memref<1x128xf32, #tpu.memory_space<vmem>>, vector<1x128xf32>
    %4 = vector.broadcast %3 : vector<1x128xf32> to vector<8x128xf32>
    %5 = arith.addf %2, %4 : vector<8x128xf32>
    %6 = arith.mulf %5, %5 : vector<8x128xf32>
    %cst_5 = arith.constant dense<0.000000e+00> : vector<8xf32>
    %7 = vector.multi_reduction <add>, %6, %cst_5 [1] : vector<8x128xf32> to vector<8xf32>
    %8 = vector.shape_cast %7 : vector<8xf32> to vector<8x1xf32>
    %cst_6 = arith.constant 1.000000e-24 : f32
    %9 = vector.broadcast %cst_6 : f32 to vector<8x1xf32>
    %10 = arith.maximumf %8, %9 : vector<8x1xf32>
    %11 = math.rsqrt %10 : vector<8x1xf32>
    %12 = vector.broadcast %11 : vector<8x1xf32> to vector<8x128xf32>
    %13 = arith.mulf %5, %12 : vector<8x128xf32>
    %c0_7 = arith.constant 0 : index
    %c0_8 = arith.constant 0 : index
    %14 = vector.load %arg4[%c0_7, %c0_8] : memref<8x128xf32, #tpu.memory_space<vmem>>, vector<8x128xf32>
    tpu.vector_store %arg4[%c0_7, %c0_8], %13 {strides = array<i32>} : memref<8x128xf32, #tpu.memory_space<vmem>>, vector<8x128xf32>,
    return
  }
  func.func @transform_0(%arg0: i32) -> (i32, i32) {
    %c0_i32 = arith.constant 0 : i32
    %c0_i32_0 = arith.constant 0 : i32
    return %arg0, %c0_i32 : i32, i32
  }
  func.func @transform_1(%arg0: i32) -> (i32, i32) {
    %c0_i32 = arith.constant 0 : i32
    %c0_i32_0 = arith.constant 0 : i32
    %c0_i32_1 = arith.constant 0 : i32
    return %c0_i32, %c0_i32_0 : i32, i32
  }
  func.func @transform_2(%arg0: i32) -> (i32, i32) {
    %c0_i32 = arith.constant 0 : i32
    %c0_i32_0 = arith.constant 0 : i32
    %c0_i32_1 = arith.constant 0 : i32
    return %c0_i32, %c0_i32_0 : i32, i32
  }
  func.func @transform_3(%arg0: i32) -> (i32, i32) {
    %c0_i32 = arith.constant 0 : i32
    %c0_i32_0 = arith.constant 0 : i32
    return %arg0, %c0_i32 : i32, i32
  }
}

</mosaic_0001>

<bundles_post_ra>
// kernel: tpu_custom_call.1
= control target key start
LH: loop header
LB: loop body
LE: loop exit
PB: predicated region body
PF: predicated region fallthrough
CT: control target
= control target key end

     0   :  { %8 = vsyncpa [#allocation3], 0  ;;  %s243_s0 = inlined_call_operand.hbm [shape: f32[8,128], index: 0, kind: input, shape index: {}]   ;;  %s244_s1 = inlined_call_operand.hbm [shape: f32[128,128], index: 1, kind: input, shape index: {}]   ;;  %s245_s2 = inlined_call_operand.vmem [shape: f32[1,128], index: 2, kind: input, shape index: {}]   ;;  %s246_s3 = inlined_call_operand.hbm [shape: f32[8,128], index: 3, kind: output, shape index: {}]  }
   0x1   :  { %9 = vsyncpa [#allocation6], 0 }
   0x2   :  { %10 = vsyncpa [#allocation4], 0  ;;  %s16_s14 = sshll.u32 %s243_s0, 4  ;;  %s206_s15 = smov [#allocation2]   ;;  %s17_s14 = int_to_ptr.hbm [resolvable:$true] %s16_s14 }
   0x3   :  { %s18_s16 = sshll.u32 %s206_s15, 4  ;;  %s26_s19 = sshll.u32 %s244_s1, 4  ;;  %s19_s16 = int_to_ptr.vmem [resolvable:$true] %s18_s16  ;;  %s27_s19 = int_to_ptr.hbm [resolvable:$true] %s26_s19 }
   0x4   :  { %21 = dma.hbm_to_vmem [thread:$0]  %s17_s14, 128, %s19_s16, [#allocation3]  }
   0x5   :  { %s207_s20 = smov [#allocation5]   ;;  %s208_s22 = smov 128  }
   0x6   :  { %s28_s21 = sshll.u32 %s207_s20, 4  ;;  %s209_s23 = smov 8   ;;  %s29_s21 = int_to_ptr.vmem [resolvable:$true] %s28_s21 }
   0x7   :  { %34 = dma.hbm_to_vmem [thread:$0]  %s27_s19, 2048, %s29_s21, [#allocation6], %s208_s22, %s208_s22, %s209_s23  }
   0x8   :  { %200 = dma.done.wait [#allocation3], 128  }
   0x9   :  { %201 = vsyncadd [#allocation3], 4294967168 }
   0xa   :  { %202 = dma.done.wait [#allocation6], 2048  }
   0xb   :  { %203 = vsyncadd [#allocation6], 4294965248  ;;  %v61_v0 = vld [vmem:[#allocation5 + $0x78] sm:$0xff]  ;;  %v60_v1 = vld [vmem:[#allocation5 + $0x70] sm:$0xff]  ;;  %s210_s24 = smov [#allocation7]  }
   0xc   :  { %66 = vmatpush.msra.mxu0 %v61_v0  ;;  %v59_v2 = vld [vmem:[#allocation5 + $0x68] sm:$0xff]  ;;  %v58_v3 = vld [vmem:[#allocation5 + $0x60] sm:$0xff]  ;;  %v57_v4 = vld [vmem:[#allocation5 + $0x58] sm:$0xff]  ;;  %s107_s25 = sshll.u32 %s210_s24, 4  ;;  %s108_s25 = int_to_ptr.vmem [resolvable:$true] %s107_s25 }
   0xd   :  { %v56_v5 = vld [vmem:[#allocation5 + $0x50] sm:$0xff]  ;;  %v55_v6 = vld [vmem:[#allocation5 + $0x48] sm:$0xff]  ;;  %v54_v7 = vld [vmem:[#allocation5 + $0x40] sm:$0xff] }
   0xe   :  { %67 = vmatpush.msra.mxu0 %v60_v1  ;;  %v53_v8 = vld [vmem:[#allocation5 + $0x38] sm:$0xff]  ;;  %v52_v9 = vld [vmem:[#allocation5 + $0x30] sm:$0xff]  ;;  %v51_v10 = vld [vmem:[#allocation5 + $0x28] sm:$0xff] }
   0xf   :  { %v50_v11 = vld [vmem:[#allocation5 + $0x20] sm:$0xff]  ;;  %v49_v12 = vld [vmem:[#allocation5 + $0x18] sm:$0xff]  ;;  %v48_v13 = vld [vmem:[#allocation5 + $0x10] sm:$0xff] }
  0x10   :  { %68 = vmatpush.msra.mxu0 %v59_v2  ;;  %v47_v14 = vld [vmem:[#allocation5 + $0x8] sm:$0xff]  ;;  %v46_v15 = vld [vmem:[#allocation5] sm:$0xff]  ;;  %v45_v16 = vld [vmem:[#allocation2] sm:$0xff] }
  0x11   :  { %v125_v17 = vld [vmem:[%s245_s2] ss:$0 sm:$0xff]  ;;  %s109_s2 = sshll.u32 %s246_s3, 4  ;;  %s110_s2 = int_to_ptr.hbm [resolvable:$true] %s109_s2 }
  0x12   :  { %69 = vmatpush.msra.mxu0 %v58_v3 }
  0x14   :  { %70 = vmatpush.msra.mxu0 %v57_v4 }
  0x16   :  { %71 = vmatpush.msra.mxu0 %v56_v5 }
  0x18   :  { %72 = vmatpush.msra.mxu0 %v55_v6 }
  0x1a   :  { %73 = vmatpush.msra.mxu0 %v54_v7 }
  0x1c   :  { %74 = vmatpush.msra.mxu0 %v53_v8 }
  0x1e   :  { %75 = vmatpush.msra.mxu0 %v52_v9 }
  0x20   :  { %76 = vmatpush.msra.mxu0 %v51_v10 }
  0x22   :  { %77 = vmatpush.msra.mxu0 %v50_v11 }
  0x24   :  { %78 = vmatpush.msra.mxu0 %v49_v12 }
  0x26   :  { %79 = vmatpush.msra.mxu0 %v48_v13 }
  0x28   :  { %80 = vmatpush.msra.mxu0 %v47_v14 }
  0x2a   :  { %81 = vmatpush.msra.mxu0 %v46_v15 }
  0x2b   :  { %82 = vmatmul.f32.vlgmr.msra.gmra.mxu0 %v45_v16 }
  0xa8   :  { %v83_v18 = vpop.f32.mrf.mxu0 }
  0xa9   :  { %v84_v19 = vadd.f32 %v125_v17, %v83_v18 }
  0xab   :  { %v86_v20 = vmul.f32 %v84_v19, %v84_v19 }
  0xad   :  { %87 = vadd.xlane.f32.xlu0 %v86_v20 }
 0x120   :  { %v88_v21 = vpop.xlane.xlu0 %87 }
 0x121   :  { %v89_v22 = vmax.f32 %v88_v21, 1e-24 }
 0x123   :  { %126 = vrsqrt.f32 %v89_v22  ;;  %vm96_vm1 = vweird.f32 %v89_v22 }
 0x129   :  { %v127_v23 = vpop.eup %126 }
 0x12a   :  { %v91_v24 = vmul.f32 %v127_v23, %v89_v22  ;;  %vm97_vm0 = vweird.f32 %v127_v23 }
 0x12b   :  { %vm98_vm2 = vmor %vm96_vm1, %vm97_vm0 }
 0x12c   :  { %v92_v25 = vmul.f32 %v127_v23, %v91_v24 }
 0x12e   :  { %v93_v26 = vmul.f32 0.5, %v92_v25 }
 0x130   :  { %v94_v27 = vsub.f32 1.5, %v93_v26 }
 0x132   :  { %v95_v28 = vmul.f32 %v127_v23, %v94_v27 }
 0x134   :  { %v99_v29 = vsel %vm98_vm2, %v127_v23, %v95_v28 }
 0x135   :  { %v100_v30 = vmul.f32 %v99_v29, %v84_v19 }
 0x137   :  { %101 = vst [vmem:[#allocation7] sm:$0xff] %v100_v30 }
 0x138   :  { %112 = dma.vmem_to_hbm [thread:$0]  %s108_s25, 128, %s110_s2, [#allocation4]  }
 0x139   :  { %204 = dma.done.wait [#allocation4], 128  }
 0x13a   :  { %205 = vsyncadd [#allocation4], 4294967168 }
 0x13b   :  { %117 = vsyncpa [#allocation3], 1 }
 0x13c   :  { %118 = vsyncpa [#allocation6], 1 }
 0x13d   :  { %119 = vsyncpa [#allocation4], 1 }

// kernel: tpu_custom_call.1
= control target key start
LH: loop header
LB: loop body
LE: loop exit
PB: predicated region body
PF: predicated region fallthrough
CT: control target
= control target key end

     0   :  { %8 = vsyncpa [#allocation3], 0  ;;  %s243_s0 = inlined_call_operand.hbm [shape: f32[8,128], index: 0, kind: input, shape index: {}]   ;;  %s244_s1 = inlined_call_operand.hbm [shape: f32[128,128], index: 1, kind: input, shape index: {}]   ;;  %s245_s2 = inlined_call_operand.vmem [shape: f32[1,128], index: 2, kind: input, shape index: {}]   ;;  %s246_s3 = inlined_call_operand.hbm [shape: f32[8,128], index: 3, kind: output, shape index: {}]  }
   0x1   :  { %9 = vsyncpa [#allocation6], 0 }
   0x2   :  { %10 = vsyncpa [#allocation4], 0  ;;  %s16_s14 = sshll.u32 %s243_s0, 4  ;;  %s206_s15 = smov [#allocation2]   ;;  %s17_s14 = int_to_ptr.hbm [resolvable:$true] %s16_s14 }
   0x3   :  { %s18_s16 = sshll.u32 %s206_s15, 4  ;;  %s26_s19 = sshll.u32 %s244_s1, 4  ;;  %s19_s16 = int_to_ptr.vmem [resolvable:$true] %s18_s16  ;;  %s27_s19 = int_to_ptr.hbm [resolvable:$true] %s26_s19 }
   0x4   :  { %21 = dma.hbm_to_vmem [thread:$0]  %s17_s14, 128, %s19_s16, [#allocation3]  }
   0x5   :  { %s207_s20 = smov [#allocation5]   ;;  %s208_s22 = smov 128  }
   0x6   :  { %s28_s21 = sshll.u32 %s207_s20, 4  ;;  %s209_s23 = smov 8   ;;  %s29_s21 = int_to_ptr.vmem [resolvable:$true] %s28_s21 }
   0x7   :  { %34 = dma.hbm_to_vmem [thread:$0]  %s27_s19, 2048, %s29_s21, [#allocation6], %s208_s22, %s208_s22, %s209_s23  }
   0x8   :  { %200 = dma.done.wait [#allocation3], 128  }
   0x9   :  { %201 = vsyncadd [#allocation3], 4294967168 }
   0xa   :  { %202 = dma.done.wait [#allocation6], 2048  }
   0xb   :  { %203 = vsyncadd [#allocation6], 4294965248  ;;  %v61_v0 = vld [vmem:[#allocation5 + $0x78] sm:$0xff]  ;;  %v60_v1 = vld [vmem:[#allocation5 + $0x70] sm:$0xff]  ;;  %s210_s24 = smov [#allocation7]  }
   0xc   :  { %66 = vmatpush.msra.mxu0 %v61_v0  ;;  %v59_v2 = vld [vmem:[#allocation5 + $0x68] sm:$0xff]  ;;  %v58_v3 = vld [vmem:[#allocation5 + $0x60] sm:$0xff]  ;;  %v57_v4 = vld [vmem:[#allocation5 + $0x58] sm:$0xff]  ;;  %s107_s25 = sshll.u32 %s210_s24, 4  ;;  %s108_s25 = int_to_ptr.vmem [resolvable:$true] %s107_s25 }
   0xd   :  { %v56_v5 = vld [vmem:[#allocation5 + $0x50] sm:$0xff]  ;;  %v55_v6 = vld [vmem:[#allocation5 + $0x48] sm:$0xff]  ;;  %v54_v7 = vld [vmem:[#allocation5 + $0x40] sm:$0xff] }
   0xe   :  { %67 = vmatpush.msra.mxu0 %v60_v1  ;;  %v53_v8 = vld [vmem:[#allocation5 + $0x38] sm:$0xff]  ;;  %v52_v9 = vld [vmem:[#allocation5 + $0x30] sm:$0xff]  ;;  %v51_v10 = vld [vmem:[#allocation5 + $0x28] sm:$0xff] }
   0xf   :  { %v50_v11 = vld [vmem:[#allocation5 + $0x20] sm:$0xff]  ;;  %v49_v12 = vld [vmem:[#allocation5 + $0x18] sm:$0xff]  ;;  %v48_v13 = vld [vmem:[#allocation5 + $0x10] sm:$0xff] }
  0x10   :  { %68 = vmatpush.msra.mxu0 %v59_v2  ;;  %v47_v14 = vld [vmem:[#allocation5 + $0x8] sm:$0xff]  ;;  %v46_v15 = vld [vmem:[#allocation5] sm:$0xff]  ;;  %v45_v16 = vld [vmem:[#allocation2] sm:$0xff] }
  0x11   :  { %v125_v17 = vld [vmem:[%s245_s2] ss:$0 sm:$0xff]  ;;  %s109_s2 = sshll.u32 %s246_s3, 4  ;;  %s110_s2 = int_to_ptr.hbm [resolvable:$true] %s109_s2 }
  0x12   :  { %69 = vmatpush.msra.mxu0 %v58_v3 }
  0x14   :  { %70 = vmatpush.msra.mxu0 %v57_v4 }
  0x16   :  { %71 = vmatpush.msra.mxu0 %v56_v5 }
  0x18   :  { %72 = vmatpush.msra.mxu0 %v55_v6 }
  0x1a   :  { %73 = vmatpush.msra.mxu0 %v54_v7 }
  0x1c   :  { %74 = vmatpush.msra.mxu0 %v53_v8 }
  0x1e   :  { %75 = vmatpush.msra.mxu0 %v52_v9 }
  0x20   :  { %76 = vmatpush.msra.mxu0 %v51_v10 }
  0x22   :  { %77 = vmatpush.msra.mxu0 %v50_v11 }
  0x24   :  { %78 = vmatpush.msra.mxu0 %v49_v12 }
  0x26   :  { %79 = vmatpush.msra.mxu0 %v48_v13 }
  0x28   :  { %80 = vmatpush.msra.mxu0 %v47_v14 }
  0x2a   :  { %81 = vmatpush.msra.mxu0 %v46_v15 }
  0x2b   :  { %82 = vmatmul.f32.vlgmr.msra.gmra.mxu0 %v45_v16 }
  0xa8   :  { %v83_v18 = vpop.f32.mrf.mxu0 }
  0xa9   :  { %v84_v19 = vadd.f32 %v125_v17, %v83_v18 }
  0xab   :  { %v86_v20 = vmul.f32 %v84_v19, %v84_v19 }
  0xad   :  { %87 = vadd.xlane.f32.xlu0 %v86_v20 }
 0x120   :  { %v88_v21 = vpop.xlane.xlu0 %87 }
 0x121   :  { %v89_v22 = vmax.f32 %v88_v21, 1e-24 }
 0x123   :  { %126 = vrsqrt.f32 %v89_v22  ;;  %vm96_vm1 = vweird.f32 %v89_v22 }
 0x129   :  { %v127_v23 = vpop.eup %126 }
 0x12a   :  { %v91_v24 = vmul.f32 %v127_v23, %v89_v22  ;;  %vm97_vm0 = vweird.f32 %v127_v23 }
 0x12b   :  { %vm98_vm2 = vmor %vm96_vm1, %vm97_vm0 }
 0x12c   :  { %v92_v25 = vmul.f32 %v127_v23, %v91_v24 }
 0x12e   :  { %v93_v26 = vmul.f32 0.5, %v92_v25 }
 0x130   :  { %v94_v27 = vsub.f32 1.5, %v93_v26 }
 0x132   :  { %v95_v28 = vmul.f32 %v127_v23, %v94_v27 }
 0x134   :  { %v99_v29 = vsel %vm98_vm2, %v127_v23, %v95_v28 }
 0x135   :  { %v100_v30 = vmul.f32 %v99_v29, %v84_v19 }
 0x137   :  { %101 = vst [vmem:[#allocation7] sm:$0xff] %v100_v30 }
 0x138   :  { %112 = dma.vmem_to_hbm [thread:$0]  %s108_s25, 128, %s110_s2, [#allocation4]  }
 0x139   :  { %204 = dma.done.wait [#allocation4], 128  }
 0x13a   :  { %205 = vsyncadd [#allocation4], 4294967168 }
 0x13b   :  { %117 = vsyncpa [#allocation3], 1 }
 0x13c   :  { %118 = vsyncpa [#allocation6], 1 }
 0x13d   :  { %119 = vsyncpa [#allocation4], 1 }

</bundles_post_ra>
